<compile_context>
chip_gen: v7x
topology: tpu7x:2x2x1
jax: 0.10.0
libtpu: 0.0.40
codegen_flags: <defaults>
</compile_context>

<pallas_src>
import math
import numpy as np
import jax
import jax.numpy as jnp
from jax.experimental import pallas as pl
from jax.experimental.pallas import tpu as pltpu


def lora_qkv_kernel(x_ref, w_ref, bias_ref, a_ref, b_ref, o_ref):
    """One (tm, C) token tile x one C-wide qkv stripe (q / k / v group).

    o = x @ W_stripe + bias_stripe + (x @ [Aq | Av]) @ B_stripe
    where B_stripe is the (2r, C) column stripe of the folded [Bq | 0 | Bv].
    """
    x = x_ref[...]                                                        # (tm, C) bf16

    # Base projection for this stripe (MXU, f32 accumulate).
    acc = jnp.dot(x, w_ref[...], preferred_element_type=jnp.float32)     # (tm, C) f32

    # Folded LoRA: (tm, C)@(C, 2r) -> (tm, 2r); (tm, 2r)@(2r, C) -> (tm, C).
    # For the k stripe B_stripe is all zeros (cost ~0.2% of total MXU work).
    # NOTE: mid is rounded f32->bf16 before the second dot; one extra bf16 rounding
    # on the low-rank path, the delta magnitudes are small so this is well inside
    # tolerance.
    mid = jnp.dot(x, a_ref[...], preferred_element_type=jnp.float32)     # (tm, 2r) f32
    acc = acc + jnp.dot(mid.astype(b_ref.dtype), b_ref[...],
                        preferred_element_type=jnp.float32)              # (tm, C)

    # Bias add fused in the f32 pass; single cast on store (bf16 out by default ->
    # lane-dense, halved writeback).
    o_ref[...] = (acc + bias_ref[...]).astype(o_ref.dtype)


def _round_up(x, m):
    return -(-x // m) * m


def _pick_vmem_limit(est_bytes):
    """Footprint-based VMEM request, capped at 75% of physical (headroom for
    compiler-internal scratch).  Falls back to a v7x-conservative 64 MiB physical."""
    try:
        phys = int(pltpu.get_tpu_info().vmem_capacity_bytes)
    except Exception:
        phys = 64 * 1024 * 1024
    cap = (3 * phys) // 4
    return int(min(max(2 * est_bytes, 32 * 1024 * 1024), cap))


def prepare_lora_qkv_weights(wqkv, bias, aq, bq, av, bv, *, compute_dtype=jnp.bfloat16):
    """Fold the LoRA operands once; cache the result while LoRA weights are frozen.

    Inputs are in right-multiply layout:
        wqkv: (C, 3C)   bias: (3C,)   aq/av: (C, r)   bq/bv: (r, C)
    Returns (w, bias2, a_cat, b_cat) ready for lora_qkv_folded().
    """
    C = wqkv.shape[0]
    r = aq.shape[1]
    w = wqkv.astype(compute_dtype)                                   # (C, 3C)
    a_cat = jnp.concatenate([aq, av], axis=1).astype(compute_dtype)  # (C, 2r)
    b_cat = jnp.zeros((2 * r, 3 * C), compute_dtype)
    b_cat = b_cat.at[:r, :C].set(bq.astype(compute_dtype))           # q delta -> cols [0:C]
    b_cat = b_cat.at[r:, 2 * C:].set(bv.astype(compute_dtype))       # v delta -> cols [2C:3C]
    bias2 = bias.reshape(1, 3 * C).astype(jnp.float32)
    return w, bias2, a_cat, b_cat


def lora_qkv_folded(x, w, bias2, a_cat, b_cat, *, tm=512, out_dtype=None,
                    vmem_limit_bytes=None):
    """x: (B, H, W, C) -> (B, H, W, 3C) using pre-folded operands."""
    B, H, W, C = x.shape
    compute_dtype = w.dtype
    if out_dtype is None:
        out_dtype = compute_dtype          # bf16 out: halves writeback + out VMEM
    r2 = a_cat.shape[1]                    # 2 * lora rank
    N = B * H * W

    # tm: multiple of 8, and small enough that the parallel token axis has >= 2
    # steps when possible (v7x has 2 TensorCores).  No host-side pad copy: the grid
    # uses cdiv and Pallas masks the ragged last token block.
    tm_cap = _round_up(max(pl.cdiv(N, 2), 8), 8)
    tm = max(8, min(_round_up(tm, 8), tm_cap))
    nt = pl.cdiv(N, tm)

    x2 = x.reshape(N, C).astype(compute_dtype)

    if vmem_limit_bytes is None:
        cd = np.dtype(compute_dtype).itemsize
        od = np.dtype(out_dtype).itemsize
        est = (2 * C * C * cd              # Wqkv stripe, double-buffered
               + 2 * tm * C * cd           # x tile, double-buffered
               + 2 * tm * C * od           # out tile, double-buffered
               + tm * C * 4                # f32 accumulator intermediate
               + C * r2 * cd + 2 * r2 * C * cd + 2 * C * 4)   # A, B stripe, bias
        vmem_limit_bytes = _pick_vmem_limit(est)

    out = pl.pallas_call(
        lora_qkv_kernel,
        out_shape=jax.ShapeDtypeStruct((N, 3 * C), out_dtype),
        grid_spec=pltpu.PrefetchScalarGridSpec(
            num_scalar_prefetch=0,
            # axis 0: qkv group stripe (q / k / v); axis 1 (innermost): token tiles,
            # so each weight stripe stays resident across the whole token sweep.
            grid=(3, nt),
            in_specs=[
                pl.BlockSpec((tm, C), lambda j, i: (i, 0)),    # x tile (re-read per stripe; compute-bound)
                pl.BlockSpec((C, C), lambda j, i: (0, j)),     # Wqkv stripe (bf16)
                pl.BlockSpec((1, C), lambda j, i: (0, j)),     # bias stripe (f32)
                pl.BlockSpec((C, r2), lambda j, i: (0, 0),     # [Aq | Av]: constant index ->
                             pipeline_mode=pl.Buffered(1)),    #   single buffer, never re-DMA'd
                pl.BlockSpec((r2, C), lambda j, i: (0, j)),    # [Bq | 0 | Bv] stripe
            ],
            out_specs=pl.BlockSpec((tm, C), lambda j, i: (i, j)),
        ),
        compiler_params=pltpu.CompilerParams(
            # Every output block is written exactly once -> both axes independent.
            dimension_semantics=("parallel", "parallel"),
            vmem_limit_bytes=vmem_limit_bytes,
        ),
    )(x2, w, bias2, a_cat, b_cat)

    return out.reshape(B, H, W, 3 * C)


def lora_qkv(x, wqkv, bias, aq, bq, av, bv, *, tm=512, compute_dtype=jnp.bfloat16,
             out_dtype=None, vmem_limit_bytes=None):
    """Convenience wrapper: fold weights and run (fold once + cache in real use)."""
    folded = prepare_lora_qkv_weights(wqkv, bias, aq, bq, av, bv,
                                      compute_dtype=compute_dtype)
    return lora_qkv_folded(x, *folded, tm=tm, out_dtype=out_dtype,
                           vmem_limit_bytes=vmem_limit_bytes)


def lora_qkv_reference(x, wqkv, bias, aq, bq, av, bv, compute_dtype=jnp.bfloat16):
    """Pure-JAX reference of _LoRA_qkv.forward on the same bf16-rounded operands."""
    f32 = jnp.float32
    C = x.shape[-1]
    xb = x.astype(compute_dtype).astype(f32)
    w = wqkv.astype(compute_dtype).astype(f32)
    aqb, bqb = aq.astype(compute_dtype).astype(f32), bq.astype(compute_dtype).astype(f32)
    avb, bvb = av.astype(compute_dtype).astype(f32), bv.astype(compute_dtype).astype(f32)

    qkv = jnp.einsum("bhwc,cd->bhwd", xb, w) + bias.astype(f32)
    dq = jnp.einsum("bhwc,cr,rd->bhwd", xb, aqb, bqb)
    dv = jnp.einsum("bhwc,cr,rd->bhwd", xb, avb, bvb)
    qkv = qkv.at[..., :C].add(dq)
    qkv = qkv.at[..., -C:].add(dv)
    return qkv


if __name__ == "__main__":
    key = jax.random.PRNGKey(0)
    # Small but lane-friendly shapes: C=128 (stripe width = 128 lanes), N = B*H*W = 256.
    B, Hh, Ww, C = 2, 16, 8, 128
    r = 4                           # LoRA rank

    ks = jax.random.split(key, 7)

    # Frozen qkv Linear(dim, dim*3): torch default init ~ U(-1/sqrt(C), 1/sqrt(C)).
    bound = 1.0 / math.sqrt(C)
    wqkv = jax.random.uniform(ks[0], (C, 3 * C), jnp.float32, -bound, bound)
    bias = jax.random.uniform(ks[1], (3 * C,), jnp.float32, -bound, bound)

    # LoRA A mats: kaiming_uniform_(a=sqrt(5)) -> bound ~ 1/sqrt(fan_in).
    aq = jax.random.uniform(ks[2], (C, r), jnp.float32, -bound, bound)
    av = jax.random.uniform(ks[3], (C, r), jnp.float32, -bound, bound)
    # LoRA B mats: module zero-inits them; small nonzero values so the path is exercised.
    bq = 0.05 * jax.random.normal(ks[4], (r, C), jnp.float32)
    bv = 0.05 * jax.random.normal(ks[5], (r, C), jnp.float32)

    x = jax.random.normal(ks[6], (B, Hh, Ww, C), jnp.float32)

    # Fold once (cached while LoRA weights are frozen), then run the kernel.
    folded = prepare_lora_qkv_weights(wqkv, bias, aq, bq, av, bv)
    out = lora_qkv_folded(x, *folded)
    out = jax.block_until_ready(out)

    ref = lora_qkv_reference(x, wqkv, bias, aq, bq, av, bv)
    assert out.shape == (B, Hh, Ww, 3 * C)
    err = jnp.max(jnp.abs(out.astype(jnp.float32) - ref))
    # Tolerance reflects bf16 compute + bf16 output storage.
    assert err < 3e-2, f"mismatch vs JAX reference (max abs err {err})"

    # TODO(synk): the rest of LoRA_Sam.forward just delegates to the wrapped SAM model
    # (image encoder / mask decoder), which is out of scope for a single kernel.
    print("KERNEL_OK")
</pallas_src>

<mosaic_0001>
module attributes {stable_mosaic.version = 11 : i64} {
  func.func @lora_qkv_kernel(%arg0: i32, %arg1: i32, %arg2: memref<128x128xbf16, #tpu.memory_space<vmem>>, %arg3: memref<128x128xbf16, #tpu.memory_space<vmem>>, %arg4: memref<1x128xf32, #tpu.memory_space<vmem>>, %arg5: memref<128x8xbf16, #tpu.memory_space<vmem>>, %arg6: memref<8x128xbf16, #tpu.memory_space<vmem>>, %arg7: memref<128x128xbf16, #tpu.memory_space<vmem>>) attributes {dimension_semantics = [#tpu.dimension_semantics<parallel>, #tpu.dimension_semantics<parallel>], iteration_bounds = array<i64: 3, 2>, scalar_prefetch = 0 : i64, scratch_operands = 0 : i64, tpu.core_type = #tpu.core_type<tc>, window_params = [{transform_indices = @transform_0, window_bounds = array<i64: 128, 128>}, {transform_indices = @transform_1, window_bounds = array<i64: 128, 128>}, {transform_indices = @transform_2, window_bounds = array<i64: 1, 128>}, {pipeline_mode = #tpu.pipeline_mode<synchronous>, transform_indices = @transform_3, window_bounds = array<i64: 128, 8>}, {transform_indices = @transform_4, window_bounds = array<i64: 8, 128>}, {transform_indices = @transform_5, window_bounds = array<i64: 128, 128>}]} {
    %c0 = arith.constant 0 : index
    %c0_0 = arith.constant 0 : index
    %0 = vector.load %arg2[%c0, %c0_0] : memref<128x128xbf16, #tpu.memory_space<vmem>>, vector<128x128xbf16>
    %c0_1 = arith.constant 0 : index
    %c0_2 = arith.constant 0 : index
    %1 = vector.load %arg3[%c0_1, %c0_2] : memref<128x128xbf16, #tpu.memory_space<vmem>>, vector<128x128xbf16>
    %cst = arith.constant dense<0.000000e+00> : vector<128x128xf32>
    %2 = tpu.matmul %0, %1, %cst {dimension_numbers = #tpu.dot_dimension_numbers<[1], [0], [0], [1], [0, 0, 1, 1], [], []>} : vector<128x128xbf16>, vector<128x128xbf16>, vector<128x128xf32> -> vector<128x128xf32>
    %c0_3 = arith.constant 0 : index
    %c0_4 = arith.constant 0 : index
    %3 = vector.load %arg5[%c0_3, %c0_4] : memref<128x8xbf16, #tpu.memory_space<vmem>>, vector<128x8xbf16>
    %cst_5 = arith.constant dense<0.000000e+00> : vector<128x8xf32>
    %4 = tpu.matmul %0, %3, %cst_5 {dimension_numbers = #tpu.dot_dimension_numbers<[1], [0], [0], [1], [0, 0, 1, 1], [], []>} : vector<128x128xbf16>, vector<128x8xbf16>, vector<128x8xf32> -> vector<128x8xf32>
    %5 = arith.truncf %4 : vector<128x8xf32> to vector<128x8xbf16>
    %c0_6 = arith.constant 0 : index
    %c0_7 = arith.constant 0 : index
    %6 = vector.load %arg6[%c0_6, %c0_7] : memref<8x128xbf16, #tpu.memory_space<vmem>>, vector<8x128xbf16>
    %cst_8 = arith.constant dense<0.000000e+00> : vector<128x128xf32>
    %7 = tpu.matmul %5, %6, %cst_8 {dimension_numbers = #tpu.dot_dimension_numbers<[1], [0], [0], [1], [0, 0, 1, 1], [], []>} : vector<128x8xbf16>, vector<8x128xbf16>, vector<128x128xf32> -> vector<128x128xf32>
    %8 = arith.addf %2, %7 : vector<128x128xf32>
    %c0_9 = arith.constant 0 : index
    %c0_10 = arith.constant 0 : index
    %9 = vector.load %arg4[%c0_9, %c0_10] : memref<1x128xf32, #tpu.memory_space<vmem>>, vector<1x128xf32>
    %10 = vector.broadcast %9 : vector<1x128xf32> to vector<128x128xf32>
    %11 = arith.addf %8, %10 : vector<128x128xf32>
    %12 = arith.truncf %11 : vector<128x128xf32> to vector<128x128xbf16>
    %c0_11 = arith.constant 0 : index
    %c0_12 = arith.constant 0 : index
    %13 = vector.load %arg7[%c0_11, %c0_12] : memref<128x128xbf16, #tpu.memory_space<vmem>>, vector<128x128xbf16>
    tpu.vector_store %arg7[%c0_11, %c0_12], %12 {strides = array<i32>} : memref<128x128xbf16, #tpu.memory_space<vmem>>, vector<128x128xbf16>,
    return
  }
  func.func @transform_0(%arg0: i32, %arg1: i32) -> (i32, i32) {
    %c0_i32 = arith.constant 0 : i32
    %c0_i32_0 = arith.constant 0 : i32
    return %arg1, %c0_i32 : i32, i32
  }
  func.func @transform_1(%arg0: i32, %arg1: i32) -> (i32, i32) {
    %c0_i32 = arith.constant 0 : i32
    %c0_i32_0 = arith.constant 0 : i32
    return %c0_i32, %arg0 : i32, i32
  }
  func.func @transform_2(%arg0: i32, %arg1: i32) -> (i32, i32) {
    %c0_i32 = arith.constant 0 : i32
    %c0_i32_0 = arith.constant 0 : i32
    return %c0_i32, %arg0 : i32, i32
  }
  func.func @transform_3(%arg0: i32, %arg1: i32) -> (i32, i32) {
    %c0_i32 = arith.constant 0 : i32
    %c0_i32_0 = arith.constant 0 : i32
    %c0_i32_1 = arith.constant 0 : i32
    return %c0_i32, %c0_i32_0 : i32, i32
  }
  func.func @transform_4(%arg0: i32, %arg1: i32) -> (i32, i32) {
    %c0_i32 = arith.constant 0 : i32
    %c0_i32_0 = arith.constant 0 : i32
    return %c0_i32, %arg0 : i32, i32
  }
  func.func @transform_5(%arg0: i32, %arg1: i32) -> (i32, i32) {
    %c0_i32 = arith.constant 0 : i32
    return %arg1, %arg0 : i32, i32
  }
}

</mosaic_0001>

<bundles_post_ra>
// kernel: tpu_custom_call.1
= control target key start
LH: loop header
LB: loop body
LE: loop exit
PB: predicated region body
PF: predicated region fallthrough
CT: control target
= control target key end

     0   :  { %s2238_s0 = inlined_call_operand.hbm [shape: bf16[256,128], index: 0, kind: input, shape index: {}]   ;;  %s2239_s1 = inlined_call_operand.hbm [shape: bf16[128,384], index: 1, kind: input, shape index: {}]   ;;  %s2240_s2 = inlined_call_operand.vmem [shape: f32[1,384], index: 2, kind: input, shape index: {}]   ;;  %s2241_s3 = inlined_call_operand.vmem [shape: bf16[128,8], index: 3, kind: input, shape index: {}]   ;;  %s2242_s4 = inlined_call_operand.vmem [shape: bf16[8,384], index: 4, kind: input, shape index: {}]   ;;  %s2243_s5 = inlined_call_operand.hbm [shape: bf16[256,384], index: 5, kind: output, shape index: {}]  }
   0x1   :  { %2255 = sst [smem:[#allocation17_spill]] %s2238_s0 }
   0x2   :  { %2256 = sst [smem:[#allocation18_spill]] %s2240_s2 }
   0x3   :  { %2257 = sst [smem:[#allocation19_spill]] %s2243_s5 }
   0x4   :  { %10 = vsyncpa [#allocation3], 0 }
   0x5   :  { %12 = vsyncpa [#allocation3 + $0x1], 0 }
   0x6   :  { %13 = vsyncpa [#allocation6], 0 }
   0x7   :  { %15 = vsyncpa [#allocation6 + $0x1], 0 }
   0x8   :  { %16 = vsyncpa [#allocation4], 0 }
   0x9   :  { %18 = vsyncpa [#allocation4 + $0x1], 0  ;;  %s1786_s18 = smov 0   ;;  %s1788_s19 = smov 0  }
   0xa   :  { %s1790_s20 = smov 0   ;;  %s1792_s21 = smov 0  }
   0xb   :  { %s1794_s22 = smov 0   ;;  %s1796_s23 = smov 0  }
   0xc   :  { %s1798_s24 = smov 0   ;;  %s1800_s25 = smov 0  }
   0xd   :  { %s1802_s26 = smov 0   ;;  %s1804_s27 = smov 0  }
   0xe   :  { %s1806_s28 = smov 0   ;;  %s1808_s29 = smov 0  }
   0xf   :  { %s1810_s30 = smov 0   ;;  %s1812_s6 = smov 0  }
  0x10 LB: > { %2258 = sst [smem:[#allocation11_spill]] %s1729_s27  ;;  %s1100_s7 = sadd.s32 4294967295, %s1745_s6   ;;  %s1745_s6 = sphi %s1812_s6, %s24_s6   ;;  %s1741_s30 = sphi %s1810_s30, %s2304_s30   ;;  %s1737_s29 = sphi %s1808_s29, %s2291_s29   ;;  %s1733_s28 = sphi %s1806_s28, %s2303_s28   ;;  %s1729_s27 = sphi %s1804_s27, %s2302_s27   ;;  %s1725_s26 = sphi %s1802_s26, %s2301_s26   ;;  %s1721_s25 = sphi %s1800_s25, %s2300_s25   ;;  %s1717_s24 = sphi %s1798_s24, %s2299_s24   ;;  %s1713_s23 = sphi %s1796_s23, %s2298_s23   ;;  %s1709_s22 = sphi %s1794_s22, %s2297_s22   ;;  %s1705_s21 = sphi %s1792_s21, %s2296_s21   ;;  %s1701_s20 = sphi %s1790_s20, %s2295_s20   ;;  %s1697_s19 = sphi %s1788_s19, %s2294_s19   ;;  %s1693_s18 = sphi %s1786_s18, %s2293_s18  }
  0x11   : > { %2259 = sst [smem:[#allocation12_spill]] %s1737_s29  ;;  %s1101_s8 = sadd.s32 4294967294, %s1745_s6  }
  0x12   : > { %s33_s9 = sadd.s32 1, %s1737_s29  ;;  %s36_s10 = sadd.s32 1, %s1741_s30 }
  0x13   : > { %p34_p0 = scmp.ge.s32.totalorder %s33_s9, 2  ;;  %s43_s11 = sadd.s32 1, %s1725_s26 }
  0x14   : > { %p50_p1 = scmp.ne.s32.totalorder %s1725_s26, %s1721_s25  ;;  %p2249_p2 = scmp.eq.s32.totalorder %s1745_s6, 0 }
  0x15   : > { %s2306_s9 = smov (%p34_p0, %s33_s9), 0  ;;  %s2308_s10 = smov (!%p34_p0, %s36_s10), %s1741_s30 }
  0x16   : > { %2260 = sst [smem:[#allocation13_spill]] %s2306_s9  ;;  %s40_s12 = ssub.s32 %s1737_s29, %s2306_s9 }
  0x17   : > { %p1869_p3 = por %p2249_p2, %p50_p1  ;;  %p38_p4 = scmp.ge.s32.totalorder %s2308_s10, 3 }
  0x18   : > { %p41_p5 = scmp.eq.s32.totalorder %s40_s12, 0  ;;  %p56_p6 = scmp.ne.s32.totalorder %s1721_s25, %s1717_s24 }
  0x19   : > { %p1874_p7 = scmp.eq.s32.totalorder %s1100_s7, 0  ;;  %s2310_s10 = smov (%p38_p4, %s2308_s10), 0 }
  0x1a   : > { %2263 = sst [smem:[#allocation14_spill]] %s2310_s10  ;;  %s1891_s17 = ssub.s32 %s1741_s30, %s2310_s10 }
  0x1b   : > { %s1881_s15 = scalar_select %p41_p5, %s1725_s26, %s43_s11  }
  0x1c   : > { %p1885_p8 = por %p1874_p7, %p56_p6  ;;  %s167_s24 = sor.u32 %s1891_s17, %s40_s12 }
  0x1d   : > { %2264 = sst [smem:[#allocation15_spill]] %s1881_s15  ;;  %p168_p10 = scmp.eq.s32.totalorder %s167_s24, 0 }
  0x1e   : > { %s2265_s16 = scalar_select %p1885_p8, 1, 0 }
  0x1f   : > { %s170_s9 = sadd.s32 1, %s1701_s20  ;;  %p180_p11 = scmp.ne.s32.totalorder %s1701_s20, %s1697_s19 }
  0x20   : > { %p181_p12 = scmp.eq.s32.totalorder %s1100_s7, 5  ;;  %p186_p0 = scmp.ne.s32.totalorder %s1697_s19, %s1693_s18 }
  0x21   : > { %s1899_s11 = scalar_select %p168_p10, %s1701_s20, %s170_s9  }
  0x22   : > { %p1901_p13 = por %p181_p12, %p180_p11  ;;  %p187_p1 = scmp.eq.s32.totalorder %s1101_s8, 5 }
  0x23   : > { %2266 = sst [smem:[#allocation16_spill]] %s1899_s11  ;;  %p2248_p4 = scmp.lt.s32.totalorder %s1745_s6, 6 }
  0x24   : > { %s2267_s15 = scalar_select %p1901_p13, 1, 0 }
  0x25   : > { %s210_s10 = sand.u32 1, %s1725_s26   ;;  %p1909_p5 = por %p187_p1, %p186_p0 }
  0x26   : > { %s1104_s12 = sshll.u32 %s210_s10, 6  ;;  %s1169_s24 = sshll.u32 %s1737_s29, 10 }
  0x27   : > { %s2268_s5 = scalar_select %p1909_p5, 1, 0 }
  0x28   : > { %s2269_s0 = sld [smem:[#allocation17_spill]]  ;;  %s214_s9 = scalar_lea.vmem [#allocation2], %s1104_s12 }
  0x29   : > { %s221_s11 = sshll.u32 %s214_s9, 4  ;;  %p1923_p6 = pnand %p2248_p4, %p1869_p3  ;;  %s1927_s11 = int_to_ptr.vmem [resolvable:$true] %s221_s11 }
  0x2a   : > { %s1929_s29 = scalar_lea.sflag [#allocation3], %s210_s10 }
  0x2b   : > { %p1537_p11 = pneg %p1923_p6 }
  0x2e   : > { %s1917_s7 = scalar_lea.hbm %s2269_s0, %s1169_s24  ;;  %s1540_s12 = scalar_lea.hbm %s2269_s0, 2048 }
  0x2f   : > { %s1535_s2 = scalar_lea.hbm %s1917_s7, 1024  ;;  %p1541_p3 = scmp.lt.u32.totalorder %s1917_s7, %s2269_s0 }
  0x30   : > { %p1536_p10 = scmp.ne.s32.totalorder %s1917_s7, %s1535_s2  ;;  %p1542_p1 = scmp.lt.u32.totalorder %s1540_s12, %s1535_s2 }
  0x31   : > { %p1544_p2 = scmp.lt.u32.totalorder %s1535_s2, %s1917_s7 }
  0x32   : > { %p1538_p12 = pnand %p1537_p11, %p1536_p10  ;;  %p1543_p4 = por %p1542_p1, %p1541_p3 }
  0x34   : > { %p1539_p0 = pneg %p1538_p12  ;;  %p1545_p9 = por %p1544_p2, %p1543_p4 }
  0x36   : > { %p1546_p5 = pnand %p1545_p9, %p1539_p0 }
  0x38   : > { %1549 = shalt.err (!%p1546_p5)
}
  0x39   : > { %s1550_s10 = scalar_lea.vmem %s1927_s11, 1024  ;;  %s1747_s27 = smov [#allocation2]  }
  0x3a   : > { %p1551_p10 = scmp.ne.s32.totalorder %s1927_s11, %s1550_s10  ;;  %s1555_s13 = sshll.u32 %s1747_s27, 4  ;;  %s1556_s13 = int_to_ptr.vmem [resolvable:$false] %s1555_s13 }
  0x3b   : > { %s1557_s24 = scalar_lea.vmem %s1556_s13, 2048  ;;  %p1558_p8 = scmp.lt.s32.totalorder %s1927_s11, %s1556_s13 }
  0x3c   : > { %p1553_p12 = pnand %p1551_p10, %p1537_p11  ;;  %p1559_p3 = scmp.lt.s32.totalorder %s1557_s24, %s1550_s10 }
  0x3e   : > { %p1554_p13 = pneg %p1553_p12  ;;  %p1560_p1 = por %p1559_p3, %p1558_p8 }
  0x40   : > { %p1561_p2 = pnand %p1560_p1, %p1554_p13 }
  0x42   : > { %1564 = shalt.err (!%p1561_p2)
}
  0x43   : > { %s2252_s2 = smov 64   ;;  %s2253_s12 = smov 4  }
  0x44   : > { %1383 = dma.hbm_to_vmem [thread:$0]  (!%p1923_p6), %s1917_s7, 1024, %s1927_s11, %s1929_s29, %s2252_s2, %s2252_s2, %s2253_s12  }
  0x45   : > { %p1109_p8 = scmp.ge.s32.totalorder %s1745_s6, 1  ;;  %p262_p9 = scmp.lt.s32.totalorder %s1745_s6, 7 }
  0x46   : > { %s69_s10 = sadd.s32 1, %s1713_s23  ;;  %p2272_p4 = scmp.eq.s32.totalorder %s1891_s17, 0 }
  0x47   : > { %p1962_p13 = pnand %p1109_p8, %p262_p9  ;;  %p76_p5 = scmp.ne.s32.totalorder %s1713_s23, %s1709_s22 }
  0x48   : > { %s1970_s27 = scalar_select %p2272_p4, %s1713_s23, %s69_s10  }
  0x49   : > { %p82_p11 = scmp.ne.s32.totalorder %s1709_s22, %s1705_s21  ;;  %s231_s13 = sand.u32 1, %s1713_s23  }
  0x4a   : > { %s1108_s24 = sshll.u32 %s1741_s30, 6  ;;  %p2273_p0 = scmp.eq.s32.totalorder %s1745_s6, 0 }
  0x4b   : > { %p1982_p12 = por %p82_p11, %p1874_p7  ;;  %s1107_s11 = sshll.u32 %s231_s13, 6 }
  0x4c   : > { %p78_p10 = por %p76_p5, %p2273_p0  ;;  %s1989_s2 = scalar_lea.hbm %s2239_s1, %s1108_s24 }
  0x4d   : > { %s2274_s29 = scalar_select %p1982_p12, 1, 0 }
  0x4e   : > { %s235_s21 = scalar_lea.vmem [#allocation5], %s1107_s11  ;;  %p2275_p6 = scmp.lt.s32.totalorder %s1745_s6, 6 }
  0x4f   : > { %s241_s17 = sshll.u32 %s235_s21, 4  ;;  %s1999_s14 = scalar_lea.sflag [#allocation6], %s231_s13  ;;  %s1997_s17 = int_to_ptr.vmem [resolvable:$true] %s241_s17 }
  0x50   : > { %p1993_p3 = pnand %p2275_p6, %p78_p10  ;;  %s1565_s7 = scalar_lea.hbm %s1989_s2, 1024 }
  0x51   : > { %p1566_p7 = scmp.ne.s32.totalorder %s1989_s2, %s1565_s7  ;;  %s1570_s8 = scalar_lea.hbm %s2239_s1, 3072 }
  0x52   : > { %p1567_p1 = pneg %p1993_p3  ;;  %p1571_p9 = scmp.lt.u32.totalorder %s1989_s2, %s2239_s1 }
  0x53   : > { %p1572_p4 = scmp.lt.u32.totalorder %s1570_s8, %s1565_s7  ;;  %p1574_p11 = scmp.lt.u32.totalorder %s1565_s7, %s1989_s2 }
  0x54   : > { %p1568_p2 = pnand %p1567_p1, %p1566_p7 }
  0x55   : > { %p1573_p5 = por %p1572_p4, %p1571_p9 }
  0x56   : > { %p1569_p8 = pneg %p1568_p2 }
  0x57   : > { %p1575_p0 = por %p1574_p11, %p1573_p5 }
  0x59   : > { %p1576_p10 = pnand %p1575_p0, %p1569_p8 }
  0x5b   : > { %1579 = shalt.err (!%p1576_p10)
}
  0x5c   : > { %s1580_s13 = scalar_lea.vmem %s1997_s17, 1024  ;;  %s1750_s24 = smov [#allocation5]  }
  0x5d   : > { %p1581_p6 = scmp.ne.s32.totalorder %s1997_s17, %s1580_s13  ;;  %s1585_s11 = sshll.u32 %s1750_s24, 4  ;;  %s1586_s11 = int_to_ptr.vmem [resolvable:$false] %s1585_s11 }
  0x5e   : > { %s1587_s12 = scalar_lea.vmem %s1586_s11, 2048  ;;  %p1588_p12 = scmp.lt.s32.totalorder %s1997_s17, %s1586_s11 }
  0x5f   : > { %p1583_p7 = pnand %p1581_p6, %p1567_p1  ;;  %p1589_p9 = scmp.lt.s32.totalorder %s1587_s12, %s1580_s13 }
  0x61   : > { %p1584_p2 = pneg %p1583_p7  ;;  %p1590_p4 = por %p1589_p9, %p1588_p12 }
  0x63   : > { %p1591_p5 = pnand %p1590_p4, %p1584_p2 }
  0x65   : > { %1594 = shalt.err (!%p1591_p5)
}
  0x66   : > { %s1751_s7 = smov 192   ;;  %s2277_s8 = smov 4  }
  0x67   : > { %s2278_s21 = smov 64   ;;  %266 = sbr.rel (%p1962_p13) target bundleno = 657 (0x291), region = 40 }
  0x68   : > { %1386 = dma.hbm_to_vmem [thread:$0]  (!%p1993_p3), %s1989_s2, 1024, %s1997_s17, %s1999_s14, %s1751_s7, %s2278_s21, %s2277_s8  }
  0x69   : > { %s268_s24 = sand.u32 (!%p1962_p13), 1, %s1721_s25   ;;  %p2279_p12 = scmp.ne.s32.totalorder (!%p1962_p13), %s2265_s16, 0 }
  0x6a   : > { %s1110_s11 = sshll.u32 (!%p1962_p13), %s268_s24, 6  ;;  %s269_s13 = scalar_lea.sflag (!%p1962_p13), [#allocation3], %s268_s24 }
  0x6b   : > { %s2032_s12 = scalar_lea.vmem (!%p1962_p13), [#allocation2], %s1110_s11 }
  0x6e   : > { %1680 = dma.done.wait (%p2279_p12), %s269_s13, 1024  }
  0x6f   : > { %1682 = vsyncadd (%p2279_p12), %s269_s13, 4294966272  ;;  %s277_s10 = sand.u32 1, %s1709_s22   ;;  %p2280_p13 = scmp.ne.s32.totalorder %s2274_s29, 0 }
  0x70   : > { %s1111_s0 = sshll.u32 %s277_s10, 6  ;;  %s278_s2 = scalar_lea.sflag [#allocation6], %s277_s10 }
  0x71   : > { %s2039_s17 = scalar_lea.vmem [#allocation5], %s1111_s0 }
  0x72   : > { %1684 = dma.done.wait (%p2280_p13), %s278_s2, 1024  }
  0x73   : > { %1686 = vsyncadd (%p2280_p13), %s278_s2, 4294966272  ;;  %v1511_v0 = vld [vmem:[%s2241_s3] sm:$0xff]   ;;  %v1512_v1 = vld [vmem:[%s2241_s3 + $0x8] sm:$0xff]   ;;  %p321_p3 = scmp.lt.s32.totalorder %s1733_s28, 2  ;;  %vm605_vm0 = vcmask 1043456   ;;  %vm580_vm1 = vcmask 64512  }
  0x74   : > { %1274 = vmatprep.subr.bf16.mxu0 %v1511_v0  ;;  %v1513_v2 = vld [vmem:[%s2241_s3 + $0x10] sm:$0xff]   ;;  %v1514_v3 = vld [vmem:[%s2241_s3 + $0x18] sm:$0xff]   ;;  %v2058_v4 = vld [vmem:[%s2032_s12] sm:$0xff]   ;;  %s2281_s24 = sld [smem:[#allocation18_spill]]  ;;  %s317_s13 = sand.u32 1, %s1697_s19  }
  0x75   : > { %1275 = vmatpush3.bf16.msra.mxu0 %v1511_v0  ;;  %1290 = vmatprep.mubr.bf16.mxu0 %v2058_v4  ;;  %v1515_v5 = vld [vmem:[%s2241_s3 + $0x20] sm:$0xff]   ;;  %v1516_v6 = vld [vmem:[%s2241_s3 + $0x28] sm:$0xff]   ;;  %v1517_v7 = vld [vmem:[%s2241_s3 + $0x30] sm:$0xff]   ;;  %s2103_s16 = scalar_select %p321_p3, %s1733_s28, 2 }
  0x76   : > { %1276 = vmatprep.subr.bf16.mxu0 %v1512_v1  ;;  %v1518_v8 = vld [vmem:[%s2241_s3 + $0x38] sm:$0xff]   ;;  %v2074_v9 = vld [vmem:[%s2032_s12 + $0x8] sm:$0xff]   ;;  %v2077_v10 = vld [vmem:[%s2032_s12 + $0x10] sm:$0xff]   ;;  %s1112_s10 = sshll.u32 %s317_s13, 6  ;;  %s2282_s9 = sld [smem:[#allocation11_spill]] }
  0x77   : > { %v2082_v11 = vld [vmem:[%s2032_s12 + $0x18] sm:$0xff]   ;;  %v2085_v12 = vld [vmem:[%s2032_s12 + $0x20] sm:$0xff]   ;;  %v2090_v13 = vld [vmem:[%s2032_s12 + $0x28] sm:$0xff]   ;;  %s1113_s8 = sshll.u32 %s2103_s16, 2  ;;  %s2140_s2 = scalar_lea.vmem [#allocation7], %s1112_s10 }
  0x78   : > { %v2093_v14 = vld [vmem:[%s2032_s12 + $0x30] sm:$0xff]   ;;  %v2098_v15 = vld [vmem:[%s2032_s12 + $0x38] sm:$0xff]   ;;  %s327_s29 = scalar_lea.vmem %s2242_s4, %s1113_s8  ;;  %v1527_v18 = vld [vmem:[%s2039_s17] sm:$0xff]   ;;  %s2283_s21 = sld [smem:[#allocation19_spill]] }
  0x79   : > { %1277 = vmatpush3.bf16.msra.mxu0 %v1512_v1  ;;  %v579_v16 = vld [vmem:[%s327_s29] sm:$0xf]  ;;  %v1528_v25 = vld [vmem:[%s2039_s17 + $0x8] sm:$0xff]   ;;  %v1529_v28 = vld [vmem:[%s2039_s17 + $0x10] sm:$0xff]   ;;  %p2285_p8 = scmp.ne.s32.totalorder %s2267_s15, 0 }
  0x7a   : > { %1278 = vmatprep.subr.bf16.mxu0 %v1513_v2  ;;  %1372 = vmatprep.subr.msk.bf16.mxu1 %vm605_vm0, %v579_v16  ;;  %v607_v17 = vsel %vm605_vm0, %v579_v16, 0  ;;  %v1530_v33 = vld [vmem:[%s2039_s17 + $0x18] sm:$0xff]   ;;  %v1531_v36 = vld [vmem:[%s2039_s17 + $0x20] sm:$0xff]   ;;  %v1532_v41 = vld [vmem:[%s2039_s17 + $0x28] sm:$0xff]   ;;  %s323_s11 = scalar_lea.vmem %s2281_s24, %s2103_s16  ;;  %s970_s16 = sshll.u32 %s2140_s2, 4  ;;  %s2151_s16 = int_to_ptr.vmem [resolvable:$true] %s970_s16 }
  0x7b   : > { %1307 = vmatpush3.bf16.msra.mxu1 %v607_v17  ;;  %v1533_v44 = vld [vmem:[%s2039_s17 + $0x30] sm:$0xff]   ;;  %v1534_v49 = vld [vmem:[%s2039_s17 + $0x38] sm:$0xff]   ;;  %v1146_v50 = vld [vmem:[%s323_s11] ss:$0 sm:$0xff]  ;;  %s2162_s17 = scalar_lea.sflag [#allocation4], %s317_s13  ;;  %s1595_s24 = scalar_lea.vmem %s2151_s16, 1024 }
  0x7c   : > { %1324 = vmatprep.subr.bf16.mxu1 %v1527_v18  ;;  %s1373_s14 = smul.u32 48, %s2282_s9  ;;  %p1596_p1 = scmp.ne.s32.totalorder %s2151_s16, %s1595_s24 }
  0x7d   : > { %1279 = vmatpush3.bf16.msra.mxu0 %v1513_v2  ;;  %s1752_s11 = smov [#allocation7]  }
  0x7e   : > { %1280 = vmatprep.subr.bf16.mxu0 %v1514_v3  ;;  %s967_s7 = sadd.s32 %s1733_s28, %s1373_s14  ;;  %s2284_s12 = smov %s2283_s21 }
  0x7f   : > { %s1166_s8 = sshll.u32 %s967_s7, 6  ;;  %p1597_p11 = pnand %p1596_p1, %p2285_p8 }
  0x80   : > { %s2156_s29 = scalar_lea.hbm %s2283_s21, %s1166_s8  ;;  %s1599_s10 = sshll.u32 %s1752_s11, 4  ;;  %s1600_s10 = int_to_ptr.vmem [resolvable:$false] %s1599_s10 }
  0x81   : > { %1281 = vmatpush3.bf16.msra.mxu0 %v1514_v3  ;;  %p1598_p0 = pneg %p1597_p11  ;;  %s1601_s9 = scalar_lea.vmem %s1600_s10, 2048 }
  0x82   : > { %1282 = vmatprep.subr.bf16.mxu0 %v1515_v5  ;;  %p1602_p10 = scmp.lt.s32.totalorder %s2151_s16, %s1600_s10  ;;  %p1603_p6 = scmp.lt.s32.totalorder %s1601_s9, %s1595_s24 }
  0x84   : > { %p1604_p7 = por %p1603_p6, %p1602_p10 }
  0x85   : > { %1283 = vmatpush3.bf16.msra.mxu0 %v1515_v5 }
  0x86   : > { %1284 = vmatprep.subr.bf16.mxu0 %v1516_v6  ;;  %p1605_p2 = pnand %p1604_p7, %p1598_p0 }
  0x89   : > { %1285 = vmatpush3.bf16.msra.mxu0 %v1516_v6 }
  0x8a   : > { %1286 = vmatprep.subr.bf16.mxu0 %v1517_v7 }
  0x8d   : > { %1287 = vmatpush3.bf16.msra.mxu0 %v1517_v7 }
  0x8e   : > { %1288 = vmatprep.subr.bf16.mxu0 %v1518_v8 }
  0x91   : > { %1289 = vmatpush3.bf16.msra.mxu0 %v1518_v8 }
  0x94   : > { %1291 = vmatmul.mubr.bf16.vlgmr.msra.gmra.mrb[0].mxu0 %v2074_v9 }
  0x95   : > { %1294 = vmatprep.mubr.bf16.mxu0 %v2077_v10 }
  0x9c   : > { %1295 = vmatmul.mubr.bf16.gmra.mrb[4].mxu0 %v2082_v11 }
  0x9d   : > { %1298 = vmatprep.mubr.bf16.mxu0 %v2085_v12 }
  0xa4   : > { %1299 = vmatmul.mubr.bf16.gmra.mrb[8].mxu0 %v2090_v13 }
  0xa5   : > { %1302 = vmatprep.mubr.bf16.mxu0 %v2093_v14 }
  0xac   : > { %1303 = vmatmul.mubr.bf16.gmra.mrb[12].mxu0 %v2098_v15 }
 0x167   : > { %v1292_v19 = vpop.f32.mrb[0].mxu0 }
 0x168   : > { %v508_v20 = vpop.f32.mrb[1].mxu0 }
 0x169   : > { %v1293_v21 = vpop.f32.mrb[2].mxu0 }
 0x16a   : > { %v572_v22 = vpack.c.bf16 %v1293_v21, %v1292_v19  ;;  %v511_v23 = vpop.f32.mrb[3].mxu0 }
 0x16b   : > { %v571_v24 = vpack.c.bf16 %v511_v23, %v508_v20 }
 0x16d   : > { %1308 = vmatprep.mubr.msk.bf16.mxu1 %vm580_vm1, %v571_v24 }
 0x16e   : > { %1309 = vmatmul.mubr.msk.bf16.vlgmr.msra.gmra.mrb[0].mxu1 %vm580_vm1, %v572_v22 }
 0x16f   : > { %1325 = vmatpush3.bf16.msra.mxu1 %v1527_v18  ;;  %v1296_v26 = vpop.f32.mrb[4].mxu0 }
 0x170   : > { %v524_v27 = vpop.f32.mrb[5].mxu0  ;;  %1326 = vmatprep.subr.bf16.mxu1 %v1528_v25 }
 0x171   : > { %v1297_v29 = vpop.f32.mrb[6].mxu0 }
 0x172   : > { %v574_v30 = vpack.c.bf16 %v1297_v29, %v1296_v26  ;;  %v527_v31 = vpop.f32.mrb[7].mxu0 }
 0x173   : > { %v573_v32 = vpack.c.bf16 %v527_v31, %v524_v27  ;;  %1327 = vmatpush3.bf16.msra.mxu1 %v1528_v25 }
 0x174   : > { %1328 = vmatprep.subr.bf16.mxu1 %v1529_v28 }
 0x175   : > { %1312 = vmatprep.mubr.msk.bf16.mxu1 %vm580_vm1, %v573_v32 }
 0x176   : > { %1313 = vmatmul.mubr.msk.bf16.gmra.mrb[4].mxu1 %vm580_vm1, %v574_v30 }
 0x177   : > { %1329 = vmatpush3.bf16.msra.mxu1 %v1529_v28  ;;  %v1300_v34 = vpop.f32.mrb[8].mxu0 }
 0x178   : > { %v540_v35 = vpop.f32.mrb[9].mxu0  ;;  %1330 = vmatprep.subr.bf16.mxu1 %v1530_v33 }
 0x179   : > { %v1301_v37 = vpop.f32.mrb[10].mxu0 }
 0x17a   : > { %v576_v38 = vpack.c.bf16 %v1301_v37, %v1300_v34  ;;  %v543_v39 = vpop.f32.mrb[11].mxu0 }
 0x17b   : > { %v575_v40 = vpack.c.bf16 %v543_v39, %v540_v35  ;;  %1331 = vmatpush3.bf16.msra.mxu1 %v1530_v33 }
 0x17c   : > { %1332 = vmatprep.subr.bf16.mxu1 %v1531_v36 }
 0x17d   : > { %1316 = vmatprep.mubr.msk.bf16.mxu1 %vm580_vm1, %v575_v40 }
 0x17e   : > { %1317 = vmatmul.mubr.msk.bf16.gmra.mrb[8].mxu1 %vm580_vm1, %v576_v38 }
 0x17f   : > { %1333 = vmatpush3.bf16.msra.mxu1 %v1531_v36  ;;  %v1304_v42 = vpop.f32.mrb[12].mxu0 }
 0x180   : > { %v556_v43 = vpop.f32.mrb[13].mxu0  ;;  %1334 = vmatprep.subr.bf16.mxu1 %v1532_v41 }
 0x181   : > { %v1305_v45 = vpop.f32.mrb[14].mxu0 }
 0x182   : > { %v578_v46 = vpack.c.bf16 %v1305_v45, %v1304_v42  ;;  %v559_v47 = vpop.f32.mrb[15].mxu0 }
 0x183   : > { %v577_v48 = vpack.c.bf16 %v559_v47, %v556_v43  ;;  %1335 = vmatpush3.bf16.msra.mxu1 %v1532_v41 }
 0x184   : > { %1336 = vmatprep.subr.bf16.mxu1 %v1533_v44 }
 0x185   : > { %1320 = vmatprep.mubr.msk.bf16.mxu1 %vm580_vm1, %v577_v48 }
 0x186   : > { %1321 = vmatmul.mubr.msk.bf16.gmra.mrb[12].mxu1 %vm580_vm1, %v578_v46 }
 0x187   : > { %1337 = vmatpush3.bf16.msra.mxu1 %v1533_v44  ;;  %1340 = vmatprep.mubr.bf16.mxu1 %v2058_v4 }
 0x188   : > { %1338 = vmatprep.subr.bf16.mxu1 %v1534_v49 }
 0x18b   : > { %1339 = vmatpush3.bf16.msra.mxu1 %v1534_v49 }
 0x18e   : > { %1341 = vmatmul.mubr.bf16.vlgmr.msra.gmra.mrb[0].mxu1 %v2074_v9 }
 0x18f   : > { %1344 = vmatprep.mubr.bf16.mxu1 %v2077_v10 }
 0x196   : > { %1345 = vmatmul.mubr.bf16.gmra.mrb[4].mxu1 %v2082_v11 }
 0x197   : > { %1348 = vmatprep.mubr.bf16.mxu1 %v2085_v12 }
 0x19e   : > { %1349 = vmatmul.mubr.bf16.gmra.mrb[8].mxu1 %v2090_v13 }
 0x19f   : > { %1352 = vmatprep.mubr.bf16.mxu1 %v2093_v14 }
 0x1a6   : > { %1353 = vmatmul.mubr.bf16.gmra.mrb[12].mxu1 %v2098_v15 }
 0x261   : > { %v1342_v51 = vpop.f32.mrb[0].mxu1 }
 0x262   : > { %v860_v52 = vadd.f32 %v1342_v51, %v1146_v50  ;;  %v788_v53 = vpop.f32.mrb[1].mxu1 }
 0x263   : > { %v858_v54 = vadd.f32 %v1146_v50, %v788_v53  ;;  %v1343_v55 = vpop.f32.mrb[2].mxu1 }
 0x264   : > { %v861_v56 = vadd.f32 %v1343_v55, %v1146_v50  ;;  %v791_v57 = vpop.f32.mrb[3].mxu1 }
 0x265   : > { %v859_v58 = vadd.f32 %v1146_v50, %v791_v57 }
 0x266   : > { %v1194_v59 = vpack.c.bf16 %v861_v56, %v860_v52 }
 0x267   : > { %v1189_v60 = vpack.c.bf16 %v859_v58, %v858_v54 }
 0x268   : > { %1226 = vst [vmem:[%s2140_s2 + $0x8] sm:$0xff] %v1194_v59  }
 0x269   : > { %1190 = vst [vmem:[%s2140_s2] sm:$0xff] %v1189_v60   ;;  %v1346_v61 = vpop.f32.mrb[4].mxu1 }
 0x26a   : > { %v864_v62 = vadd.f32 %v1346_v61, %v1146_v50  ;;  %v804_v63 = vpop.f32.mrb[5].mxu1 }
 0x26b   : > { %v862_v0 = vadd.f32 %v1146_v50, %v804_v63  ;;  %v1347_v1 = vpop.f32.mrb[6].mxu1 }
 0x26c   : > { %v865_v2 = vadd.f32 %v1347_v1, %v1146_v50  ;;  %v807_v3 = vpop.f32.mrb[7].mxu1 }
 0x26d   : > { %v863_v4 = vadd.f32 %v1146_v50, %v807_v3 }
 0x26e   : > { %v1204_v5 = vpack.c.bf16 %v865_v2, %v864_v62 }
 0x26f   : > { %v1199_v6 = vpack.c.bf16 %v863_v4, %v862_v0 }
 0x270   : > { %1228 = vst [vmem:[%s2140_s2 + $0x18] sm:$0xff] %v1204_v5  }
 0x271   : > { %1227 = vst [vmem:[%s2140_s2 + $0x10] sm:$0xff] %v1199_v6   ;;  %v1350_v7 = vpop.f32.mrb[8].mxu1 }
 0x272   : > { %v868_v8 = vadd.f32 %v1350_v7, %v1146_v50  ;;  %v820_v9 = vpop.f32.mrb[9].mxu1 }
 0x273   : > { %v866_v10 = vadd.f32 %v1146_v50, %v820_v9  ;;  %v1351_v11 = vpop.f32.mrb[10].mxu1 }
 0x274   : > { %v869_v12 = vadd.f32 %v1351_v11, %v1146_v50  ;;  %v823_v13 = vpop.f32.mrb[11].mxu1 }
 0x275   : > { %v867_v14 = vadd.f32 %v1146_v50, %v823_v13 }
 0x276   : > { %v1214_v15 = vpack.c.bf16 %v869_v12, %v868_v8 }
 0x277   : > { %v1209_v16 = vpack.c.bf16 %v867_v14, %v866_v10 }
 0x278   : > { %1230 = vst [vmem:[%s2140_s2 + $0x28] sm:$0xff] %v1214_v15  }
 0x279   : > { %1229 = vst [vmem:[%s2140_s2 + $0x20] sm:$0xff] %v1209_v16   ;;  %v1354_v17 = vpop.f32.mrb[12].mxu1 }
 0x27a   : > { %v872_v18 = vadd.f32 %v1354_v17, %v1146_v50  ;;  %v836_v19 = vpop.f32.mrb[13].mxu1 }
 0x27b   : > { %v870_v20 = vadd.f32 %v1146_v50, %v836_v19  ;;  %v1355_v21 = vpop.f32.mrb[14].mxu1 }
 0x27c   : > { %v873_v22 = vadd.f32 %v1355_v21, %v1146_v50  ;;  %v839_v23 = vpop.f32.mrb[15].mxu1 }
 0x27d   : > { %v871_v24 = vadd.f32 %v1146_v50, %v839_v23 }
 0x27e   : > { %v1224_v25 = vpack.c.bf16 %v873_v22, %v872_v18 }
 0x27f   : > { %v1219_v26 = vpack.c.bf16 %v871_v24, %v870_v20 }
 0x280   : > { %1232 = vst [vmem:[%s2140_s2 + $0x38] sm:$0xff] %v1224_v25  }
 0x281   : > { %1231 = vst [vmem:[%s2140_s2 + $0x30] sm:$0xff] %v1219_v26  }
 0x282   : > { %1608 = shalt.err (!%p1605_p2)
}
 0x283   : > { %s1609_s13 = scalar_lea.hbm %s2156_s29, 1024  ;;  %s1613_s7 = scalar_lea.hbm %s2284_s12, 6144 }
 0x284   : > { %p1610_p9 = scmp.ne.s32.totalorder %s2156_s29, %s1609_s13  ;;  %p1614_p12 = scmp.lt.u32.totalorder %s2156_s29, %s2284_s12 }
 0x285   : > { %p1615_p13 = scmp.lt.u32.totalorder %s1613_s7, %s1609_s13  ;;  %p1617_p1 = scmp.lt.u32.totalorder %s1609_s13, %s2156_s29 }
 0x286   : > { %p1611_p4 = pnand %p1610_p9, %p2285_p8 }
 0x287   : > { %p1616_p3 = por %p1615_p13, %p1614_p12 }
 0x288   : > { %p1612_p5 = pneg %p1611_p4 }
 0x289   : > { %p1618_p11 = por %p1617_p1, %p1616_p3 }
 0x28b   : > { %p1619_p0 = pnand %p1618_p11, %p1612_p5 }
 0x28d   : > { %1622 = shalt.err (!%p1619_p0)
}
 0x28e   : > { %s1753_s0 = smov 64   ;;  %s1754_s21 = smov 192  }
 0x28f   : > { %s1755_s24 = smov 4  }
 0x290   : > { %1378 = dma.vmem_to_hbm [thread:$0]  (%p2285_p8), %s2151_s16, 1024, %s2156_s29, %s2162_s17, %s1753_s0, %s1754_s21, %s1755_s24  }
 0x291 PF: > { %p1392_p10 = scmp.ge.s32.totalorder %s1745_s6, 2  ;;  %s985_s11 = sand.u32 1, %s1693_s18  }
 0x292   : > { %p2286_p6 = scmp.ne.s32.totalorder %s2268_s5, 0  ;;  %s986_s10 = scalar_lea.sflag [#allocation4], %s985_s11 }
 0x294   : > { %p1388_p7 = pnand %p1392_p10, %p2286_p6 }
 0x296   : > { %1688 = dma.done.wait (!%p1388_p7), %s986_s10, 1024  }
 0x297   : > { %1690 = vsyncadd (!%p1388_p7), %s986_s10, 4294966272  ;;  %s24_s6 = sadd.s32 1, %s1745_s6   ;;  %s2288_s15 = sld [smem:[#allocation16_spill]] }
 0x298   : > { %p2191_p2 = scmp.ge.s32.totalorder %s24_s6, 8   ;;  %s2289_s16 = sld [smem:[#allocation15_spill]] }
 0x299   : > { %s2290_s5 = sld [smem:[#allocation12_spill]]  ;;  %s2291_s29 = sld [smem:[#allocation13_spill]] }
 0x29a   : > { %s2292_s17 = sld [smem:[#allocation14_spill]]  ;;  %s2293_s18 = smov %s1697_s19 }
 0x29b   : > { %s2294_s19 = smov %s1701_s20  ;;  %s2296_s21 = smov %s1709_s22 }
 0x29c   : > { %s2297_s22 = smov %s1713_s23  ;;  %s2298_s23 = smov %s1970_s27 }
 0x29d   : > { %s2295_s20 = smov %s2288_s15  ;;  %s2299_s24 = smov %s1721_s25 }
 0x29e   : > { %s2300_s25 = smov %s1725_s26  ;;  %s2301_s26 = smov %s2289_s16 }
 0x29f   : > { %s2302_s27 = smov %s2290_s5  ;;  %s2303_s28 = smov %s1741_s30 }
 0x2a0   : > { %s2304_s30 = smov %s2292_s17  ;;  %23 = sbr.rel (!%p2191_p2) target bundleno = 16 (0x10), region = 104 }
 0x2a7   :  { %991 = vsyncpa [#allocation3], 1 }
 0x2a8   :  { %993 = vsyncpa [#allocation3 + $0x1], 1 }
 0x2a9   :  { %994 = vsyncpa [#allocation6], 1 }
 0x2aa   :  { %996 = vsyncpa [#allocation6 + $0x1], 1 }
 0x2ab   :  { %997 = vsyncpa [#allocation4], 1 }
 0x2ac   :  { %999 = vsyncpa [#allocation4 + $0x1], 1 }

</bundles_post_ra>
